<compile_context>
chip_gen: v5e
topology: v5e:2x2
jax: 0.10.0
libtpu: 0.0.40
codegen_flags: <defaults>
</compile_context>

<pallas_src>
import functools

import jax
import jax.numpy as jnp
from jax.experimental import pallas as pl
from jax.experimental.pallas import tpu as pltpu


# ----------------------------- Pallas kernel ------------------------------ #

def _double_conv_kernel(x_ref, w1_ref, s1_ref, b1_ref, w2_ref, s2_ref, b2_ref,
                        o_ref, *, L):
    """Fused (Conv1d k3p1 + BN + ReLU) x2 on a batch-folded lane slab.

    x_ref : (Cin, NLT)      f32, NLT = batch_tile * L (batch folded into lanes)
    w1_ref: (3, Cout, Cin)  bf16, leading axis = tap (-1, 0, +1)
    s1/b1 : (Cout, 1)       f32 folded BN1 scale / bias (conv1 bias folded in)
    w2_ref: (3, Cout, Cout) bf16
    s2/b2 : (Cout, 1)       f32 folded BN2 scale / bias
    o_ref : (Cout, NLT)     bf16 output slab
    """
    NLT = x_ref.shape[-1]
    pos = jax.lax.broadcasted_iota(jnp.int32, (1, NLT), 1) % L
    is_first = pos == 0        # first column of each folded batch element
    is_last = pos == L - 1     # last column of each folded batch element

    def conv_bn_relu(h, w_ref, s_ref, b_ref):
        # h: (C, NLT) f32.  Zero-padded k=3 stencil via XLU rolls (non-negative
        # shifts only) with edge masking done in f32 (v5e VPU has no bf16 path).
        zero = jnp.zeros_like(h)
        h_prev = jnp.where(is_first, zero, pltpu.roll(h, shift=1, axis=1))
        h_next = jnp.where(is_last, zero, pltpu.roll(h, shift=NLT - 1, axis=1))
        # Three accumulated per-tap MXU dots -- no im2col concat / sublane
        # re-pack; bf16 operands, f32 accumulation.
        y = jnp.dot(w_ref[0], h_prev.astype(jnp.bfloat16),
                    preferred_element_type=jnp.float32)
        y += jnp.dot(w_ref[1], h.astype(jnp.bfloat16),
                     preferred_element_type=jnp.float32)
        y += jnp.dot(w_ref[2], h_next.astype(jnp.bfloat16),
                     preferred_element_type=jnp.float32)
        y = y * s_ref[...] + b_ref[...]            # folded BN affine, f32
        return jnp.maximum(y, 0.0)                 # ReLU

    h1 = conv_bn_relu(x_ref[...], w1_ref, s1_ref, b1_ref)   # (Cout, NLT), on-chip
    h2 = conv_bn_relu(h1, w2_ref, s2_ref, b2_ref)
    o_ref[...] = h2.astype(o_ref.dtype)                     # bf16 writeback


# ------------------------------ host wrapper ------------------------------ #

def _pick_tiling(B, L, max_cols=4096):
    """Batches folded into the lane axis per grid step.

    Keep >= 2 grid steps when B allows it (v7x has two TensorCores; the extra
    step is near-free on v5e/v6e) and cap lane columns per step so the
    double-buffered blocks stay well inside v7x's 64 MiB VMEM.
    """
    grid_steps = 2 if (B >= 2 and B % 2 == 0) else 1
    batch_tile = B // grid_steps
    while batch_tile > 1 and batch_tile % 2 == 0 and batch_tile * L > max_cols:
        batch_tile //= 2
        grid_steps *= 2
    return grid_steps, batch_tile


@jax.jit
def double_conv(x, params):
    """DoubleConv forward.  x: (B, Cin, L) f32 -> (B, Cout, L) f32."""
    B, Cin, L = x.shape
    Cout = params["w1"].shape[0]
    grid_steps, batch_tile = _pick_tiling(B, L)
    NLT = batch_tile * L          # lane columns per grid step (multiple of L)
    NL = B * L

    # Fold batch into the lane axis: (B, Cin, L) -> (Cin, B*L).  x stays f32;
    # the bf16 cast happens in-kernel under the existing DMA.
    x_fold = jnp.transpose(x, (1, 0, 2)).reshape(Cin, NL)

    # (Cout, Cin, 3) -> (3, Cout, Cin): leading axis = tap (-1, 0, +1) so the
    # kernel grabs per-tap weights with a cheap leading-axis index.
    w1 = jnp.transpose(params["w1"], (2, 0, 1)).astype(jnp.bfloat16)
    w2 = jnp.transpose(params["w2"], (2, 0, 1)).astype(jnp.bfloat16)
    s1 = params["scale1"].reshape(Cout, 1).astype(jnp.float32)
    b1 = params["bias1"].reshape(Cout, 1).astype(jnp.float32)
    s2 = params["scale2"].reshape(Cout, 1).astype(jnp.float32)
    b2 = params["bias2"].reshape(Cout, 1).astype(jnp.float32)

    const2 = lambda g: (0, 0)     # weights / scales: fetched once, VMEM-resident
    const3 = lambda g: (0, 0, 0)

    out = pl.pallas_call(
        functools.partial(_double_conv_kernel, L=L),
        out_shape=jax.ShapeDtypeStruct((Cout, NL), jnp.bfloat16),
        grid_spec=pltpu.PrefetchScalarGridSpec(
            num_scalar_prefetch=0,
            grid=(grid_steps,),
            in_specs=[
                pl.BlockSpec((Cin, NLT), lambda g: (0, g)),
                pl.BlockSpec((3, Cout, Cin), const3),
                pl.BlockSpec((Cout, 1), const2),
                pl.BlockSpec((Cout, 1), const2),
                pl.BlockSpec((3, Cout, Cout), const3),
                pl.BlockSpec((Cout, 1), const2),
                pl.BlockSpec((Cout, 1), const2),
            ],
            out_specs=pl.BlockSpec((Cout, NLT), lambda g: (0, g)),
        ),
        compiler_params=pltpu.CompilerParams(
            dimension_semantics=("parallel",)),
    )(x_fold, w1, s1, b1, w2, s2, b2)

    # Un-fold to (B, Cout, L); the f32 upcast fuses with this transpose.
    return jnp.transpose(out.reshape(Cout, B, L), (1, 0, 2)).astype(jnp.float32)


# --------------------------- reference (pure JAX) -------------------------- #

def double_conv_ref(x, params):
    def convbr(h, w, scale, bias):
        y = jax.lax.conv_general_dilated(
            h, w, window_strides=(1,), padding=((1, 1),),
            dimension_numbers=("NCH", "OIH", "NCH"))
        y = y * scale.reshape(1, -1, 1) + bias.reshape(1, -1, 1)
        return jnp.maximum(y, 0.0)

    h = convbr(x, params["w1"], params["scale1"], params["bias1"])
    return convbr(h, params["w2"], params["scale2"], params["bias2"])


# --------------------------- deterministic params -------------------------- #

def init_params(key, in_channels, out_channels, eps=1e-5):
    ks = jax.random.split(key, 12)

    def convbr_params(keys, cin, cout):
        kw, kb, kg, kbeta, km, kv = keys
        w = 0.1 * jax.random.normal(kw, (cout, cin, 3), jnp.float32)
        conv_b = 0.1 * jax.random.normal(kb, (cout,), jnp.float32)
        gamma = 1.0 + 0.1 * jax.random.normal(kg, (cout,), jnp.float32)
        beta = 0.1 * jax.random.normal(kbeta, (cout,), jnp.float32)
        mean = 0.1 * jax.random.normal(km, (cout,), jnp.float32)
        var = 1.0 + 0.1 * jnp.abs(jax.random.normal(kv, (cout,), jnp.float32))
        scale = gamma / jnp.sqrt(var + eps)        # folded BN scale
        bias = beta + scale * (conv_b - mean)      # BN bias + conv bias folded
        return w, scale, bias

    w1, s1, b1 = convbr_params(ks[0:6], in_channels, out_channels)
    w2, s2, b2 = convbr_params(ks[6:12], out_channels, out_channels)
    return {"w1": w1, "scale1": s1, "bias1": b1,
            "w2": w2, "scale2": s2, "bias2": b2}


# ---------------------------------- main ----------------------------------- #

if __name__ == "__main__":
    key = jax.random.PRNGKey(0)
    in_channels, out_channels = 8, 16
    B, L = 4, 256     # L multiple of 128 (lane-dense); B=4 -> 2 grid steps,
                      # 2 batch elements folded into 512 lane columns per step

    k_x, k_p = jax.random.split(key)
    x = jax.random.normal(k_x, (B, in_channels, L), jnp.float32)
    params = init_params(k_p, in_channels, out_channels)

    out = double_conv(x, params)
    out = jax.block_until_ready(out)
    assert out.shape == (B, out_channels, L), out.shape
    assert bool(jnp.all(out >= 0.0))               # ReLU output

    ref = double_conv_ref(x, params)
    assert bool(jnp.allclose(out, ref, rtol=5e-2, atol=5e-2)), \
        float(jnp.max(jnp.abs(out - ref)))
    print("KERNEL_OK")
</pallas_src>

<mosaic_0001>
module attributes {stable_mosaic.version = 11 : i64} {
  func.func @_double_conv_kernel(%arg0: i32, %arg1: memref<8x512xf32, #tpu.memory_space<vmem>>, %arg2: memref<3x16x8xbf16, #tpu.memory_space<vmem>>, %arg3: memref<16x1xf32, #tpu.memory_space<vmem>>, %arg4: memref<16x1xf32, #tpu.memory_space<vmem>>, %arg5: memref<3x16x16xbf16, #tpu.memory_space<vmem>>, %arg6: memref<16x1xf32, #tpu.memory_space<vmem>>, %arg7: memref<16x1xf32, #tpu.memory_space<vmem>>, %arg8: memref<16x512xbf16, #tpu.memory_space<vmem>>) attributes {dimension_semantics = [#tpu.dimension_semantics<parallel>], iteration_bounds = array<i64: 2>, scalar_prefetch = 0 : i64, scratch_operands = 0 : i64, tpu.core_type = #tpu.core_type<tc>, window_params = [{transform_indices = @transform_0, window_bounds = array<i64: 8, 512>}, {pipeline_mode = #tpu.pipeline_mode<synchronous>, transform_indices = @transform_1, window_bounds = array<i64: 3, 16, 8>}, {pipeline_mode = #tpu.pipeline_mode<synchronous>, transform_indices = @transform_2, window_bounds = array<i64: 16, 1>}, {pipeline_mode = #tpu.pipeline_mode<synchronous>, transform_indices = @transform_3, window_bounds = array<i64: 16, 1>}, {pipeline_mode = #tpu.pipeline_mode<synchronous>, transform_indices = @transform_4, window_bounds = array<i64: 3, 16, 16>}, {pipeline_mode = #tpu.pipeline_mode<synchronous>, transform_indices = @transform_5, window_bounds = array<i64: 16, 1>}, {pipeline_mode = #tpu.pipeline_mode<synchronous>, transform_indices = @transform_6, window_bounds = array<i64: 16, 1>}, {transform_indices = @transform_7, window_bounds = array<i64: 16, 512>}]} {
    %0 = tpu.iota {dimensions = array<i32: 1>} : vector<1x512xi32>
    %c256_i32 = arith.constant 256 : i32
    %c0_i32 = arith.constant 0 : i32
    %1 = arith.cmpi eq, %c256_i32, %c0_i32 : i32
    %c1_i32 = arith.constant 1 : i32
    %2 = arith.select %1, %c1_i32, %c256_i32 : i32
    %3 = vector.broadcast %2 : i32 to vector<1x512xi32>
    %4 = arith.remsi %0, %3 : vector<1x512xi32>
    %c0_i32_0 = arith.constant 0 : i32
    %5 = vector.broadcast %c0_i32_0 : i32 to vector<1x512xi32>
    %6 = arith.cmpi ne, %4, %5 : vector<1x512xi32>
    %c0_i32_1 = arith.constant 0 : i32
    %7 = vector.broadcast %c0_i32_1 : i32 to vector<1x512xi32>
    %8 = arith.cmpi slt, %4, %7 : vector<1x512xi32>
    %c0_i32_2 = arith.constant 0 : i32
    %9 = arith.cmpi slt, %2, %c0_i32_2 : i32
    %10 = vector.broadcast %9 : i1 to vector<1x512xi1>
    %11 = vector.broadcast %10 : vector<1x512xi1> to vector<1x512xi1>
    %12 = arith.xori %8, %11 : vector<1x512xi1>
    %13 = arith.andi %12, %6 : vector<1x512xi1>
    %14 = vector.broadcast %2 : i32 to vector<1x512xi32>
    %15 = arith.addi %4, %14 : vector<1x512xi32>
    %16 = arith.select %13, %15, %4 : vector<1x512xi1>, vector<1x512xi32>
    %c0_i32_3 = arith.constant 0 : i32
    %17 = vector.broadcast %c0_i32_3 : i32 to vector<1x512xi32>
    %18 = arith.cmpi eq, %16, %17 : vector<1x512xi32>
    %c255_i32 = arith.constant 255 : i32
    %19 = vector.broadcast %c255_i32 : i32 to vector<1x512xi32>
    %20 = arith.cmpi eq, %16, %19 : vector<1x512xi32>
    %c0 = arith.constant 0 : index
    %c0_4 = arith.constant 0 : index
    %21 = vector.load %arg1[%c0, %c0_4] : memref<8x512xf32, #tpu.memory_space<vmem>>, vector<8x512xf32>
    %cst = arith.constant 0.000000e+00 : f32
    %22 = vector.broadcast %cst : f32 to vector<8x512xf32>
    %c1_i32_5 = arith.constant 1 : i32
    %23 = tpu.dynamic_rotate %21 by %c1_i32_5 dim 1 : vector<8x512xf32>, i32 -> vector<8x512xf32>
    %24 = vector.shape_cast %18 : vector<1x512xi1> to vector<1x512xi1>
    %25 = vector.broadcast %24 : vector<1x512xi1> to vector<8x512xi1>
    %26 = arith.select %25, %22, %23 : vector<8x512xi1>, vector<8x512xf32>
    %c511_i32 = arith.constant 511 : i32
    %27 = tpu.dynamic_rotate %21 by %c511_i32 dim 1 : vector<8x512xf32>, i32 -> vector<8x512xf32>
    %28 = vector.shape_cast %20 : vector<1x512xi1> to vector<1x512xi1>
    %29 = vector.broadcast %28 : vector<1x512xi1> to vector<8x512xi1>
    %30 = arith.select %29, %22, %27 : vector<8x512xi1>, vector<8x512xf32>
    %c0_6 = arith.constant 0 : index
    %c0_7 = arith.constant 0 : index
    %c0_8 = arith.constant 0 : index
    %31 = vector.load %arg2[%c0_6, %c0_7, %c0_8] : memref<3x16x8xbf16, #tpu.memory_space<vmem>>, vector<1x16x8xbf16>
    %32 = vector.shape_cast %31 : vector<1x16x8xbf16> to vector<16x8xbf16>
    %33 = arith.truncf %26 : vector<8x512xf32> to vector<8x512xbf16>
    %cst_9 = arith.constant dense<0.000000e+00> : vector<16x512xf32>
    %34 = tpu.matmul %32, %33, %cst_9 {dimension_numbers = #tpu.dot_dimension_numbers<[1], [0], [0], [1], [0, 0, 1, 1], [], []>} : vector<16x8xbf16>, vector<8x512xbf16>, vector<16x512xf32> -> vector<16x512xf32>
    %c1 = arith.constant 1 : index
    %c0_10 = arith.constant 0 : index
    %c0_11 = arith.constant 0 : index
    %35 = vector.load %arg2[%c1, %c0_10, %c0_11] : memref<3x16x8xbf16, #tpu.memory_space<vmem>>, vector<1x16x8xbf16>
    %36 = vector.shape_cast %35 : vector<1x16x8xbf16> to vector<16x8xbf16>
    %37 = arith.truncf %21 : vector<8x512xf32> to vector<8x512xbf16>
    %cst_12 = arith.constant dense<0.000000e+00> : vector<16x512xf32>
    %38 = tpu.matmul %36, %37, %cst_12 {dimension_numbers = #tpu.dot_dimension_numbers<[1], [0], [0], [1], [0, 0, 1, 1], [], []>} : vector<16x8xbf16>, vector<8x512xbf16>, vector<16x512xf32> -> vector<16x512xf32>
    %39 = arith.addf %34, %38 : vector<16x512xf32>
    %c2 = arith.constant 2 : index
    %c0_13 = arith.constant 0 : index
    %c0_14 = arith.constant 0 : index
    %40 = vector.load %arg2[%c2, %c0_13, %c0_14] : memref<3x16x8xbf16, #tpu.memory_space<vmem>>, vector<1x16x8xbf16>
    %41 = vector.shape_cast %40 : vector<1x16x8xbf16> to vector<16x8xbf16>
    %42 = arith.truncf %30 : vector<8x512xf32> to vector<8x512xbf16>
    %cst_15 = arith.constant dense<0.000000e+00> : vector<16x512xf32>
    %43 = tpu.matmul %41, %42, %cst_15 {dimension_numbers = #tpu.dot_dimension_numbers<[1], [0], [0], [1], [0, 0, 1, 1], [], []>} : vector<16x8xbf16>, vector<8x512xbf16>, vector<16x512xf32> -> vector<16x512xf32>
    %44 = arith.addf %39, %43 : vector<16x512xf32>
    %c0_16 = arith.constant 0 : index
    %c0_17 = arith.constant 0 : index
    %45 = vector.load %arg3[%c0_16, %c0_17] : memref<16x1xf32, #tpu.memory_space<vmem>>, vector<16x1xf32>
    %46 = vector.broadcast %45 : vector<16x1xf32> to vector<16x512xf32>
    %47 = arith.mulf %44, %46 : vector<16x512xf32>
    %c0_18 = arith.constant 0 : index
    %c0_19 = arith.constant 0 : index
    %48 = vector.load %arg4[%c0_18, %c0_19] : memref<16x1xf32, #tpu.memory_space<vmem>>, vector<16x1xf32>
    %49 = vector.broadcast %48 : vector<16x1xf32> to vector<16x512xf32>
    %50 = arith.addf %47, %49 : vector<16x512xf32>
    %cst_20 = arith.constant 0.000000e+00 : f32
    %51 = vector.broadcast %cst_20 : f32 to vector<16x512xf32>
    %52 = arith.maximumf %50, %51 : vector<16x512xf32>
    %cst_21 = arith.constant 0.000000e+00 : f32
    %53 = vector.broadcast %cst_21 : f32 to vector<16x512xf32>
    %c1_i32_22 = arith.constant 1 : i32
    %54 = tpu.dynamic_rotate %52 by %c1_i32_22 dim 1 : vector<16x512xf32>, i32 -> vector<16x512xf32>
    %55 = vector.shape_cast %18 : vector<1x512xi1> to vector<1x512xi1>
    %56 = vector.broadcast %55 : vector<1x512xi1> to vector<16x512xi1>
    %57 = arith.select %56, %53, %54 : vector<16x512xi1>, vector<16x512xf32>
    %c511_i32_23 = arith.constant 511 : i32
    %58 = tpu.dynamic_rotate %52 by %c511_i32_23 dim 1 : vector<16x512xf32>, i32 -> vector<16x512xf32>
    %59 = vector.shape_cast %20 : vector<1x512xi1> to vector<1x512xi1>
    %60 = vector.broadcast %59 : vector<1x512xi1> to vector<16x512xi1>
    %61 = arith.select %60, %53, %58 : vector<16x512xi1>, vector<16x512xf32>
    %c0_24 = arith.constant 0 : index
    %c0_25 = arith.constant 0 : index
    %c0_26 = arith.constant 0 : index
    %62 = vector.load %arg5[%c0_24, %c0_25, %c0_26] : memref<3x16x16xbf16, #tpu.memory_space<vmem>>, vector<1x16x16xbf16>
    %63 = vector.shape_cast %62 : vector<1x16x16xbf16> to vector<16x16xbf16>
    %64 = arith.truncf %57 : vector<16x512xf32> to vector<16x512xbf16>
    %cst_27 = arith.constant dense<0.000000e+00> : vector<16x512xf32>
    %65 = tpu.matmul %63, %64, %cst_27 {dimension_numbers = #tpu.dot_dimension_numbers<[1], [0], [0], [1], [0, 0, 1, 1], [], []>} : vector<16x16xbf16>, vector<16x512xbf16>, vector<16x512xf32> -> vector<16x512xf32>
    %c1_28 = arith.constant 1 : index
    %c0_29 = arith.constant 0 : index
    %c0_30 = arith.constant 0 : index
    %66 = vector.load %arg5[%c1_28, %c0_29, %c0_30] : memref<3x16x16xbf16, #tpu.memory_space<vmem>>, vector<1x16x16xbf16>
    %67 = vector.shape_cast %66 : vector<1x16x16xbf16> to vector<16x16xbf16>
    %68 = arith.truncf %52 : vector<16x512xf32> to vector<16x512xbf16>
    %cst_31 = arith.constant dense<0.000000e+00> : vector<16x512xf32>
    %69 = tpu.matmul %67, %68, %cst_31 {dimension_numbers = #tpu.dot_dimension_numbers<[1], [0], [0], [1], [0, 0, 1, 1], [], []>} : vector<16x16xbf16>, vector<16x512xbf16>, vector<16x512xf32> -> vector<16x512xf32>
    %70 = arith.addf %65, %69 : vector<16x512xf32>
    %c2_32 = arith.constant 2 : index
    %c0_33 = arith.constant 0 : index
    %c0_34 = arith.constant 0 : index
    %71 = vector.load %arg5[%c2_32, %c0_33, %c0_34] : memref<3x16x16xbf16, #tpu.memory_space<vmem>>, vector<1x16x16xbf16>
    %72 = vector.shape_cast %71 : vector<1x16x16xbf16> to vector<16x16xbf16>
    %73 = arith.truncf %61 : vector<16x512xf32> to vector<16x512xbf16>
    %cst_35 = arith.constant dense<0.000000e+00> : vector<16x512xf32>
    %74 = tpu.matmul %72, %73, %cst_35 {dimension_numbers = #tpu.dot_dimension_numbers<[1], [0], [0], [1], [0, 0, 1, 1], [], []>} : vector<16x16xbf16>, vector<16x512xbf16>, vector<16x512xf32> -> vector<16x512xf32>
    %75 = arith.addf %70, %74 : vector<16x512xf32>
    %c0_36 = arith.constant 0 : index
    %c0_37 = arith.constant 0 : index
    %76 = vector.load %arg6[%c0_36, %c0_37] : memref<16x1xf32, #tpu.memory_space<vmem>>, vector<16x1xf32>
    %77 = vector.broadcast %76 : vector<16x1xf32> to vector<16x512xf32>
    %78 = arith.mulf %75, %77 : vector<16x512xf32>
    %c0_38 = arith.constant 0 : index
    %c0_39 = arith.constant 0 : index
    %79 = vector.load %arg7[%c0_38, %c0_39] : memref<16x1xf32, #tpu.memory_space<vmem>>, vector<16x1xf32>
    %80 = vector.broadcast %79 : vector<16x1xf32> to vector<16x512xf32>
    %81 = arith.addf %78, %80 : vector<16x512xf32>
    %cst_40 = arith.constant 0.000000e+00 : f32
    %82 = vector.broadcast %cst_40 : f32 to vector<16x512xf32>
    %83 = arith.maximumf %81, %82 : vector<16x512xf32>
    %84 = arith.truncf %83 : vector<16x512xf32> to vector<16x512xbf16>
    %c0_41 = arith.constant 0 : index
    %c0_42 = arith.constant 0 : index
    %85 = vector.load %arg8[%c0_41, %c0_42] : memref<16x512xbf16, #tpu.memory_space<vmem>>, vector<16x512xbf16>
    tpu.vector_store %arg8[%c0_41, %c0_42], %84 {strides = array<i32>} : memref<16x512xbf16, #tpu.memory_space<vmem>>, vector<16x512xbf16>,
    return
  }
  func.func @transform_0(%arg0: i32) -> (i32, i32) {
    %c0_i32 = arith.constant 0 : i32
    %c0_i32_0 = arith.constant 0 : i32
    return %c0_i32, %arg0 : i32, i32
  }
  func.func @transform_1(%arg0: i32) -> (i32, i32, i32) {
    %c0_i32 = arith.constant 0 : i32
    %c0_i32_0 = arith.constant 0 : i32
    %c0_i32_1 = arith.constant 0 : i32
    %c0_i32_2 = arith.constant 0 : i32
    return %c0_i32, %c0_i32_0, %c0_i32_1 : i32, i32, i32
  }
  func.func @transform_2(%arg0: i32) -> (i32, i32) {
    %c0_i32 = arith.constant 0 : i32
    %c0_i32_0 = arith.constant 0 : i32
    %c0_i32_1 = arith.constant 0 : i32
    return %c0_i32, %c0_i32_0 : i32, i32
  }
  func.func @transform_3(%arg0: i32) -> (i32, i32) {
    %c0_i32 = arith.constant 0 : i32
    %c0_i32_0 = arith.constant 0 : i32
    %c0_i32_1 = arith.constant 0 : i32
    return %c0_i32, %c0_i32_0 : i32, i32
  }
  func.func @transform_4(%arg0: i32) -> (i32, i32, i32) {
    %c0_i32 = arith.constant 0 : i32
    %c0_i32_0 = arith.constant 0 : i32
    %c0_i32_1 = arith.constant 0 : i32
    %c0_i32_2 = arith.constant 0 : i32
    return %c0_i32, %c0_i32_0, %c0_i32_1 : i32, i32, i32
  }
  func.func @transform_5(%arg0: i32) -> (i32, i32) {
    %c0_i32 = arith.constant 0 : i32
    %c0_i32_0 = arith.constant 0 : i32
    %c0_i32_1 = arith.constant 0 : i32
    return %c0_i32, %c0_i32_0 : i32, i32
  }
  func.func @transform_6(%arg0: i32) -> (i32, i32) {
    %c0_i32 = arith.constant 0 : i32
    %c0_i32_0 = arith.constant 0 : i32
    %c0_i32_1 = arith.constant 0 : i32
    return %c0_i32, %c0_i32_0 : i32, i32
  }
  func.func @transform_7(%arg0: i32) -> (i32, i32) {
    %c0_i32 = arith.constant 0 : i32
    %c0_i32_0 = arith.constant 0 : i32
    return %c0_i32, %arg0 : i32, i32
  }
}

</mosaic_0001>

<bundles_post_ra>
// kernel: double_conv.1
= control target key start
LH: loop header
LB: loop body
LE: loop exit
PB: predicated region body
PF: predicated region fallthrough
CT: control target
= control target key end

     0   :  { %s1365_s24 = smov 0   ;;  %s1367_s25 = smov 0   ;;  %s1605_s0 = inlined_call_operand.vmem [shape: f32[8,1024], index: 0, kind: input, shape index: {}]   ;;  %s1606_s1 = inlined_call_operand.vmem [shape: bf16[3,16,8], index: 1, kind: input, shape index: {}]   ;;  %s1607_s2 = inlined_call_operand.vmem [shape: f32[16,1], index: 2, kind: input, shape index: {}]   ;;  %s1608_s3 = inlined_call_operand.vmem [shape: f32[16,1], index: 3, kind: input, shape index: {}]   ;;  %s1609_s4 = inlined_call_operand.vmem [shape: bf16[3,16,16], index: 4, kind: input, shape index: {}]   ;;  %s1610_s5 = inlined_call_operand.vmem [shape: f32[16,1], index: 5, kind: input, shape index: {}]   ;;  %s1611_s6 = inlined_call_operand.vmem [shape: f32[16,1], index: 6, kind: input, shape index: {}]   ;;  %s1612_s7 = inlined_call_operand.vmem [shape: bf16[16,1024], index: 7, kind: output, shape index: {}]  }
   0x1   :  { %s1369_s26 = smov 0  }
   0x2 LB: > { %s1378_s27 = sadd.s32 4294967295, %s1320_s26   ;;  %s1380_s28 = sadd.s32 1, %s1320_s26   ;;  %s1320_s26 = sphi %s1369_s26, %s1624_s26   ;;  %s1316_s25 = sphi %s1367_s25, %s1623_s25   ;;  %s1312_s24 = sphi %s1365_s24, %s1622_s24  }
   0x3   : > { %s173_s29 = ssub.s32 %s1320_s26, %s1380_s28  ;;  %s176_s30 = sadd.s32 1, %s1316_s25 }
   0x4   : > { %p174_p0 = scmp.eq.s32.totalorder %s173_s29, 0  ;;  %p186_p1 = scmp.ne.s32.totalorder %s1316_s25, %s1312_s24 }
   0x5   : > { %p187_p2 = scmp.eq.s32.totalorder %s1378_s27, 1  ;;  %p1126_p3 = scmp.ge.s32.totalorder %s1320_s26, 1 }
   0x6   : > { %s1388_s8 = scalar_select %p174_p0, %s1316_s25, %s176_s30  }
   0x7   : > { %p1390_p4 = por %p187_p2, %p186_p1  ;;  %p238_p5 = scmp.lt.s32.totalorder %s1320_s26, 3 }
   0x9   : > { %p239_p6 = pnand %p1126_p3, %p238_p5 }
   0xa   : > { %s1128_s10 = sshll.u32 (!%p239_p6), %s1378_s27, 2  ;;  %s1322_s15 = smov (!%p239_p6), 1  }
   0xb   : > { %242 = sbr.rel (%p239_p6) target bundleno = 616 (0x268), region = 48  ;;  %p270_p7 = scmp.lt.s32.totalorder (!%p239_p6), %s1128_s10, 7 }
   0xc   : > { %s1323_s16 = smov (!%p239_p6), 127  }
  0x10   : > { %s1626_s10 = smov (!%p270_p7, %s1128_s10), 7  ;;  %vm414_vm0 = vcmask 1043456   ;;  %v1212_v11 = vld [vmem:[%s1606_s1 + $0x8] sm:$0xff]  ;;  %vm410_vm1 = vcmask 64512   ;;  %v277_v15 = vlaneseq  ;;  %v650_v34 = vld [vmem:[%s1607_s2] sm:$0xff]  ;;  %v1324_v35 = vmov 0  }
  0x11   : > { %s1129_s11 = sshll.u32 %s1626_s10, 3  ;;  %v651_v33 = vld [vmem:[%s1607_s2 + $0x8] sm:$0xff]  ;;  %1256 = vset.pattern.permute.xlu1 %v1324_v35  ;;  %1255 = vset.pattern.permute.xlu0 %v1324_v35  ;;  %v670_v36 = vld [vmem:[%s1608_s3] sm:$0xff]  ;;  %vm780_vm8 = vcmask 130048   ;;  %s1217_s13 = sshll.u32 (%p1390_p4), %s1378_s27, 4 }
  0x12   : > { %s273_s14 = scalar_lea.vmem %s1605_s0, %s1129_s11  ;;  %v1415_v17 = vand.u32 127, %v277_v15  ;;  %1257 = vset.pattern.permute.xlu2 %v1324_v35  ;;  %v1211_v46 = vld [vmem:[%s1606_s1] sm:$0xff]  ;;  %v671_v54 = vld [vmem:[%s1608_s3 + $0x8] sm:$0xff]  ;;  %s266_s11 = sand.u32 1, %s1312_s24  }
  0x13   : > { %v339_v0 = vld [vmem:[%s273_s14 + $0x8] sm:$0xff]  ;;  %v340_v1 = vld [vmem:[%s273_s14 + $0x10] sm:$0xff]  ;;  %v338_v2 = vld [vmem:[%s273_s14] sm:$0xff]  ;;  %s1127_s12 = sshll.u32 %s266_s11, 5  ;;  %s1048_s18 = scalar_lea.vmem (%p1390_p4), %s1612_s7, %s1217_s13 }
  0x14   : > { %v1245_v3 = vpack.i.bf16 %v340_v1, %v339_v0  ;;  %342 = vrot.lane.b32.xlu1 %v338_v2, %s1322_s15  ;;  %v341_v4 = vld [vmem:[%s273_s14 + $0x18] sm:$0xff]  ;;  %371 = vrot.lane.b32.xlu2 %v340_v1, %s1323_s16  ;;  %v403_v5 = vpack.c.bf16 %v340_v1, %v340_v1  ;;  %v402_v6 = vpack.c.bf16 %v339_v0, %v339_v0  ;;  %v279_v18 = vadd.s32 128, %v1415_v17  ;;  %s1579_s24 = scalar_lea.vmem [#allocation2], %s1127_s12 }
  0x15   : > { %v404_v7 = vpack.c.bf16 %v341_v4, %v341_v4  ;;  %v401_v8 = vpack.c.bf16 %v338_v2, %v338_v2  ;;  %v1250_v14 = vpack.i.bf16 %v341_v4, %v338_v2  ;;  %v280_v20 = vadd.s32 256, %v1415_v17 }
  0x16   : > { %1246 = vrot.lane.b32.xlu0 %v1245_v3, %s1322_s15  ;;  %v422_v9 = vsel %vm414_vm0, %v403_v5, 0  ;;  %v419_v10 = vsel %vm414_vm0, %v402_v6, 0  ;;  %v293_v19 = vand.u32 255, %v279_v18  ;;  %vm375_vm2 = vcmp.lt.s32.totalorder %v1415_v17, 127 }
  0x17   : > { %462 = vmatpush.bf16.msra.mxu2 %v422_v9  ;;  %v425_v12 = vsel %vm414_vm0, %v404_v7, 0  ;;  %448 = vmatpush.bf16.msra.mxu1 %v419_v10  ;;  %v416_v13 = vsel %vm414_vm0, %v401_v8, 0  ;;  %v300_v24 = vand.u32 255, %v280_v20  ;;  %vm350_vm4 = vcmp.lt.s32.totalorder %v1415_v17, 1  ;;  %v1213_v8 = vld [vmem:[%s1606_s1 + $0x10] sm:$0xff] }
  0x18   : > { %476 = vmatpush.bf16.msra.mxu3 %v425_v12  ;;  %434 = vmatpush.bf16.msra.mxu0 %v416_v13  ;;  %vm1420_vm3 = vcmp.eq.s32.totalorder %v293_v19, 255  ;;  %v281_v29 = vadd.s32 384, %v1415_v17  ;;  %v286_v39 = vand.u32 255, %v1415_v17 }
  0x19   : > { %vm1429_vm5 = vcmp.eq.s32.totalorder %v300_v24, 0  ;;  %vm1193_vm15 = vmneg %vm1420_vm3 }
  0x1a   : > { %1138 = vmatmul.msk.bf16.vlgmr.msra.gmra.mxu2 %vm410_vm1, %v1212_v11  ;;  %1137 = vmatmul.msk.bf16.vlgmr.msra.gmra.mxu1 %vm410_vm1, %v1212_v11  ;;  %v307_v42 = vand.u32 255, %v281_v29  ;;  %vm1456_vm6 = vcmp.eq.s32.totalorder %v286_v39, 0  ;;  %vm1179_vm9 = vmneg %vm1429_vm5 }
  0x1b   : > { %1139 = vmatmul.msk.bf16.vlgmr.msra.gmra.mxu3 %vm410_vm1, %v1212_v11  ;;  %1136 = vmatmul.msk.bf16.vlgmr.msra.gmra.mxu0 %vm410_vm1, %v1212_v11  ;;  %vm1181_vm10 = vmpackc.low %vm1179_vm9, %vm1179_vm9 }
  0x1c   : > { %1251 = vrot.lane.b32.xlu1 %v1250_v14, %s1323_s16  ;;  %369 = vrot.lane.b32.xlu2 %v339_v0, %s1323_s16  ;;  %vm1460_vm7 = vcmp.eq.s32.totalorder %v307_v42, 255  ;;  %vm1172_vm11 = vmneg %vm1456_vm6 }
  0x1d   : > { %vm1174_vm12 = vmpackc.low %vm1172_vm11, %vm1172_vm11 }
  0x1e   : > { %348 = vrot.lane.b32.xlu0 %v341_v4, %s1322_s15  ;;  %vm1200_vm13 = vmneg %vm1460_vm7 }
  0x1f   : > { %vm1202_vm14 = vmpackc.low %vm1200_vm13, %vm1200_vm13 }
  0x24   : > { %659 = vperm.xlu1 %1256, %v651_v33   ;;  %674 = vperm.xlu2 %1257, %v670_v36  }
  0x26   : > { %654 = vperm.xlu0 %1255, %v650_v34  }
  0x2c   : > { %679 = vperm.xlu1 %1256, %v671_v54  }
  0x6e   : > { %v372_v16 = vpop.permute.xlu2 %371 }
  0x76   : > { %v370_v21 = vpop.permute.xlu2 %369 }
  0x77   : > { %v377_v23 = vsel %vm375_vm2, %v370_v21, %v372_v16 }
  0x78   : > { %v389_v26 = vsel %vm1420_vm3, 0.0, %v377_v23 }
  0x79   : > { %v563_v32 = vpack.c.bf16 %v389_v26, %v389_v26 }
  0x7b   : > { %v578_v44 = vsel %vm414_vm0, %v563_v32, 0 }
  0x7e   : > { %v675_v39 = vpop.permute.xlu2 %674 }
  0x86   : > { %v343_v25 = vpop.permute.xlu1 %342 }
  0x88   : > { %v1247_v27 = vpop.permute.xlu0 %1246 }
  0x89   : > { %v1249_v30 = vunpack.i.h.bf16 %v1247_v27  ;;  %v1248_v31 = vunpack.i.l.bf16 %v1247_v27 }
  0x8b   : > { %v353_v37 = vsel %vm350_vm4, %v343_v25, %v1248_v31  ;;  %v352_v38 = vsel %vm350_vm4, %v1248_v31, %v1249_v30 }
  0x8c   : > { %v395_v40 = vpack.c.bf16 %v353_v37, %v353_v37  ;;  %v365_v41 = vsel %vm1429_vm5, 0.0, %v352_v38 }
  0x8d   : > { %v396_v43 = vpack.c.bf16 %v365_v41, %v365_v41 }
  0x8e   : > { %v495_v45 = vsel %vm414_vm0, %v395_v40, 0  ;;  %v1252_v47 = vpop.permute.xlu1 %1251 }
  0x8f   : > { %524 = vmatpush.bf16.msrb.mxu1 %v495_v45  ;;  %v498_v48 = vsel %vm414_vm0, %v396_v43, 0  ;;  %v1254_v50 = vunpack.i.h.bf16 %v1252_v47  ;;  %v1253_v51 = vunpack.i.l.bf16 %v1252_v47 }
  0x90   : > { %v349_v52 = vpop.permute.xlu0 %348  ;;  %538 = vmatpush.bf16.msrb.mxu2 %v498_v48 }
  0x91   : > { %v351_v55 = vsel %vm350_vm4, %v1249_v30, %v349_v52  ;;  %v354_v56 = vsel %vm350_vm4, %v349_v52, %v343_v25  ;;  %v379_v57 = vsel %vm375_vm2, %v1254_v50, %v1253_v51  ;;  %v376_v58 = vsel %vm375_vm2, %v372_v16, %v1254_v50 }
  0x92   : > { %v397_v59 = vpack.c.bf16 %v351_v55, %v351_v55  ;;  %1145 = vmatmul.msk.bf16.vlgmr.msrb.gmra.mxu1 %vm410_vm1, %v1211_v46  ;;  %v363_v60 = vsel %vm1456_vm6, 0.0, %v354_v56  ;;  %v564_v61 = vpack.c.bf16 %v376_v58, %v376_v58  ;;  %v378_v62 = vsel %vm375_vm2, %v1253_v51, %v370_v21 }
  0x93   : > { %607 = vmatpush.bf16.msra.mxu1 %v578_v44  ;;  %1146 = vmatmul.msk.bf16.vlgmr.msrb.gmra.mxu2 %vm410_vm1, %v1211_v46  ;;  %v394_v63 = vpack.c.bf16 %v363_v60, %v363_v60  ;;  %v562_v0 = vpack.c.bf16 %v378_v62, %v378_v62  ;;  %v391_v1 = vsel %vm1460_vm7, 0.0, %v379_v57 }
  0x94   : > { %v501_v2 = vsel %vm414_vm0, %v397_v59, 0  ;;  %v581_v3 = vsel %vm414_vm0, %v564_v61, 0  ;;  %v565_v4 = vpack.c.bf16 %v391_v1, %v391_v1 }
  0x95   : > { %552 = vmatpush.bf16.msrb.mxu3 %v501_v2  ;;  %v492_v5 = vsel %vm414_vm0, %v394_v63, 0  ;;  %621 = vmatpush.bf16.msra.mxu2 %v581_v3  ;;  %v575_v6 = vsel %vm414_vm0, %v562_v0, 0 }
  0x96   : > { %510 = vmatpush.bf16.msrb.mxu0 %v492_v5  ;;  %v584_v7 = vsel %vm414_vm0, %v565_v4, 0  ;;  %v660_v29 = vpop.permute.xlu1 %659  ;;  %vm1195_vm0 = vmpackc.low %vm1193_vm15, %vm1193_vm15 }
  0x97   : > { %v450_v9 = vpop.f32.mrf.mxu1 }
  0x98   : > { %1147 = vmatmul.msk.bf16.vlgmr.msrb.gmra.mxu3 %vm410_vm1, %v1211_v46  ;;  %v436_v10 = vpop.f32.mrf.mxu0  ;;  %v655_v32 = vpop.permute.xlu0 %654 }
  0x99   : > { %635 = vmatpush.bf16.msra.mxu3 %v584_v7  ;;  %1144 = vmatmul.msk.bf16.vlgmr.msrb.gmra.mxu0 %vm410_vm1, %v1211_v46 }
  0x9a   : > { %593 = vmatpush.bf16.msra.mxu0 %v575_v6 }
  0x9d   : > { %v464_v11 = vpop.f32.mrf.mxu2 }
  0x9e   : > { %v478_v13 = vpop.f32.mrf.mxu3  ;;  %v680_v44 = vpop.permute.xlu1 %679 }
  0x9f   : > { %v452_v12 = vpop.f32.mrf.mxu1 }
  0xa0   : > { %v438_v14 = vpop.f32.mrf.mxu0 }
  0xa2   : > { %1155 = vmatmul.msk.bf16.vlgmr.msra.gmra.mxu1 %vm410_vm1, %v1213_v8 }
  0xa3   : > { %1156 = vmatmul.msk.bf16.vlgmr.msra.gmra.mxu2 %vm410_vm1, %v1213_v8 }
  0xa5   : > { %v466_v15 = vpop.f32.mrf.mxu2 }
  0xa6   : > { %v480_v18 = vpop.f32.mrf.mxu3 }
  0xa8   : > { %1157 = vmatmul.msk.bf16.vlgmr.msra.gmra.mxu3 %vm410_vm1, %v1213_v8 }
  0xa9   : > { %1154 = vmatmul.msk.bf16.vlgmr.msra.gmra.mxu0 %vm410_vm1, %v1213_v8 }
 0x10f   : > { %v526_v16 = vpop.f32.mrf.mxu1 }
 0x110   : > { %v527_v24 = vadd.f32 %v526_v16, %v450_v9 }
 0x116   : > { %v512_v19 = vpop.f32.mrf.mxu0  ;;  %v540_v20 = vpop.f32.mrf.mxu2 }
 0x117   : > { %v528_v21 = vpop.f32.mrf.mxu1  ;;  %v513_v37 = vadd.f32 %v512_v19, %v436_v10  ;;  %v541_v38 = vadd.f32 %v540_v20, %v464_v11 }
 0x118   : > { %v529_v33 = vadd.f32 %v528_v21, %v452_v12 }
 0x11b   : > { %v554_v23 = vpop.f32.mrf.mxu3 }
 0x11c   : > { %v555_v48 = vadd.f32 %v554_v23, %v478_v13 }
 0x11e   : > { %v514_v25 = vpop.f32.mrf.mxu0  ;;  %v542_v26 = vpop.f32.mrf.mxu2 }
 0x11f   : > { %v609_v27 = vpop.f32.mrf.mxu1  ;;  %v515_v51 = vadd.f32 %v514_v25, %v438_v14  ;;  %v543_v52 = vadd.f32 %v542_v26, %v466_v15 }
 0x120   : > { %v643_v30 = vadd.f32 %v609_v27, %v527_v24 }
 0x122   : > { %v663_v34 = vmul.f32 %v655_v32, %v643_v30  ;;  %v983_v30 = vld [vmem:[%s1610_s5] sm:$0xff] }
 0x123   : > { %v556_v31 = vpop.f32.mrf.mxu3 }
 0x124   : > { %v683_v45 = vadd.f32 %v675_v39, %v663_v34  ;;  %v557_v5 = vadd.f32 %v556_v31, %v480_v18  ;;  %v1003_v31 = vld [vmem:[%s1611_s6] sm:$0xff] }
 0x126   : > { %v595_v35 = vpop.f32.mrf.mxu0  ;;  %v623_v36 = vpop.f32.mrf.mxu2  ;;  %v691_v56 = vmax.f32 %v683_v45, 0.0 }
 0x127   : > { %v611_v40 = vpop.f32.mrf.mxu1  ;;  %v642_v42 = vadd.f32 %v595_v35, %v513_v37  ;;  %v644_v43 = vadd.f32 %v623_v36, %v541_v38 }
 0x128   : > { %v647_v41 = vadd.f32 %v611_v40, %v529_v33  ;;  %v1215_v33 = vld [vmem:[%s1609_s4 + $0x8] sm:$0xff] }
 0x129   : > { %v662_v54 = vmul.f32 %v655_v32, %v642_v42  ;;  %v664_v55 = vmul.f32 %v655_v32, %v644_v43  ;;  %v1214_v43 = vld [vmem:[%s1609_s4] sm:$0xff] }
 0x12a   : > { %v667_v46 = vmul.f32 %v660_v29, %v647_v41 }
 0x12b   : > { %v637_v47 = vpop.f32.mrf.mxu3  ;;  %v682_v1 = vadd.f32 %v675_v39, %v662_v54  ;;  %v684_v2 = vadd.f32 %v675_v39, %v664_v55 }
 0x12c   : > { %v687_v50 = vadd.f32 %v680_v44, %v667_v46  ;;  %v645_v58 = vadd.f32 %v637_v47, %v555_v48 }
 0x12d   : > { %v690_v11 = vmax.f32 %v682_v1, 0.0  ;;  %v692_v12 = vmax.f32 %v684_v2, 0.0 }
 0x12e   : > { %v695_v57 = vmax.f32 %v687_v50, 0.0  ;;  %v597_v59 = vpop.f32.mrf.mxu0  ;;  %v625_v60 = vpop.f32.mrf.mxu2  ;;  %v665_v6 = vmul.f32 %v655_v32, %v645_v58  ;;  %v1004_v32 = vld [vmem:[%s1611_s6 + $0x8] sm:$0xff] }
 0x12f   : > { %v646_v61 = vadd.f32 %v597_v59, %v515_v51  ;;  %v648_v62 = vadd.f32 %v625_v60, %v543_v52 }
 0x130   : > { %v1258_v63 = vpack.i.bf16 %v695_v57, %v691_v56  ;;  %v772_v0 = vpack.c.bf16 %v695_v57, %v691_v56  ;;  %v685_v15 = vadd.f32 %v675_v39, %v665_v6 }
 0x131   : > { %v666_v3 = vmul.f32 %v660_v29, %v646_v61  ;;  %v668_v4 = vmul.f32 %v660_v29, %v648_v62 }
 0x132   : > { %1259 = vrot.lane.b32.xlu2 %v1258_v63, %s1322_s15  ;;  %805 = vmatpush.bf16.msrb.mxu1 %v772_v0  ;;  %v693_v18 = vmax.f32 %v685_v15, 0.0 }
 0x133   : > { %v686_v7 = vadd.f32 %v680_v44, %v666_v3  ;;  %v688_v8 = vadd.f32 %v680_v44, %v668_v4  ;;  %v639_v9 = vpop.f32.mrf.mxu3 }
 0x134   : > { %v649_v10 = vadd.f32 %v639_v9, %v557_v5 }
 0x135   : > { %v694_v13 = vmax.f32 %v686_v7, 0.0  ;;  %v696_v14 = vmax.f32 %v688_v8, 0.0  ;;  %1165 = vmatmul.msk.bf16.vlgmr.msrb.gmra.mxu1 %vm780_vm8, %v1215_v33 }
 0x136   : > { %v669_v16 = vmul.f32 %v660_v29, %v649_v10  ;;  %v984_v29 = vld [vmem:[%s1610_s5 + $0x8] sm:$0xff] }
 0x137   : > { %v1263_v19 = vpack.i.bf16 %v696_v14, %v692_v12  ;;  %v771_v20 = vpack.c.bf16 %v694_v13, %v690_v11  ;;  %v773_v21 = vpack.c.bf16 %v696_v14, %v692_v12  ;;  %v1273_v23 = vpack.i.bf16 %v694_v13, %v690_v11 }
 0x138   : > { %v689_v24 = vadd.f32 %v680_v44, %v669_v16 }
 0x139   : > { %1264 = vrot.lane.b32.xlu0 %v1263_v19, %s1322_s15  ;;  %791 = vmatpush.bf16.msrb.mxu0 %v771_v20 }
 0x13a   : > { %v697_v25 = vmax.f32 %v689_v24, 0.0  ;;  %819 = vmatpush.bf16.msrb.mxu2 %v773_v21  ;;  %1274 = vrot.lane.b32.xlu2 %v1273_v23, %s1322_s15 }
 0x13c   : > { %v1268_v26 = vpack.i.bf16 %v697_v25, %v693_v18  ;;  %v774_v27 = vpack.c.bf16 %v697_v25, %v693_v18  ;;  %1164 = vmatmul.msk.bf16.vlgmr.msrb.gmra.mxu0 %vm780_vm8, %v1215_v33 }
 0x13d   : > { %1166 = vmatmul.msk.bf16.vlgmr.msrb.gmra.mxu2 %vm780_vm8, %v1215_v33 }
 0x13e   : > { %1269 = vrot.lane.b32.xlu1 %v1268_v26, %s1322_s15  ;;  %833 = vmatpush.bf16.msrb.mxu3 %v774_v27 }
 0x141   : > { %1279 = vrot.lane.b32.xlu0 %v1273_v23, %s1323_s16  ;;  %1167 = vmatmul.msk.bf16.vlgmr.msrb.gmra.mxu3 %vm780_vm8, %v1215_v33 }
 0x142   : > { %1289 = vrot.lane.b32.xlu2 %v1268_v26, %s1323_s16 }
 0x146   : > { %1284 = vrot.lane.b32.xlu1 %v1263_v19, %s1323_s16  ;;  %v1216_v19 = vld [vmem:[%s1609_s4 + $0x10] sm:$0xff] }
 0x149   : > { %1294 = vrot.lane.b32.xlu0 %v1258_v63, %s1323_s16 }
 0x14a   : > { %992 = vperm.xlu2 %1257, %v984_v29  }
 0x14e   : > { %987 = vperm.xlu1 %1256, %v983_v30  }
 0x151   : > { %1007 = vperm.xlu0 %1255, %v1003_v31  }
 0x156   : > { %1012 = vperm.xlu1 %1256, %v1004_v32  }
 0x18c   : > { %v1260_v34 = vpop.permute.xlu2 %1259 }
 0x18d   : > { %v1262_v36 = vunpack.i.h.bf16 %v1260_v34  ;;  %v1261_v37 = vunpack.i.l.bf16 %v1260_v34 }
 0x194   : > { %v1275_v35 = vpop.permute.xlu2 %1274 }
 0x195   : > { %v1277_v38 = vunpack.i.h.bf16 %v1275_v35  ;;  %v1276_v39 = vunpack.i.l.bf16 %v1275_v35 }
 0x197   : > { %v719_v40 = vsel %vm350_vm4, %v1277_v38, %v1262_v36  ;;  %v718_v41 = vsel %vm350_vm4, %v1276_v39, %v1261_v37 }
 0x198   : > { %v765_v42 = vpack.c.bf16 %v719_v40, %v718_v41 }
 0x19a   : > { %869 = vmatpush.bf16.msra.mxu1 %v765_v42 }
 0x19c   : > { %v1290_v50 = vpop.permute.xlu2 %1289 }
 0x19d   : > { %1178 = vmatmul.msk.bf16.vlgmr.msra.gmra.mxu1 %vm780_vm8, %v1214_v43  ;;  %v1292_v28 = vunpack.i.h.bf16 %v1290_v50  ;;  %v1291_v56 = vunpack.i.l.bf16 %v1290_v50 }
 0x1ab   : > { %v1265_v44 = vpop.permute.xlu0 %1264 }
 0x1ac   : > { %v1267_v45 = vunpack.i.h.bf16 %v1265_v44  ;;  %v1266_v46 = vunpack.i.l.bf16 %v1265_v44 }
 0x1ae   : > { %v717_v47 = vsel %vm350_vm4, %v1262_v36, %v1267_v45  ;;  %v716_v48 = vsel %vm350_vm4, %v1261_v37, %v1266_v46 }
 0x1af   : > { %v1182_v51 = vpack.c.bf16 %v717_v47, %v716_v48 }
 0x1b0   : > { %v1270_v52 = vpop.permute.xlu1 %1269 }
 0x1b1   : > { %v1272_v54 = vunpack.i.h.bf16 %v1270_v52  ;;  %v1271_v55 = vunpack.i.l.bf16 %v1270_v52  ;;  %1183 = vmatpush.bf16.msk.msra.mxu2 %vm1181_vm10, %v1182_v51 }
 0x1b2   : > { %v807_v20 = vpop.f32.mrf.mxu1 }
 0x1b3   : > { %v715_v57 = vsel %vm350_vm4, %v1267_v45, %v1272_v54  ;;  %v714_v58 = vsel %vm350_vm4, %v1266_v46, %v1271_v55  ;;  %v720_v59 = vsel %vm350_vm4, %v1271_v55, %v1276_v39  ;;  %v721_v49 = vsel %vm350_vm4, %v1272_v54, %v1277_v38  ;;  %v1280_v60 = vpop.permute.xlu0 %1279 }
 0x1b4   : > { %v767_v61 = vpack.c.bf16 %v715_v57, %v714_v58  ;;  %v1175_v62 = vpack.c.bf16 %v721_v49, %v720_v59  ;;  %v1282_v63 = vunpack.i.h.bf16 %v1280_v60  ;;  %v1281_v0 = vunpack.i.l.bf16 %v1280_v60  ;;  %1184 = vmatmul.msk.bf16.vlgmr.msra.gmra.mxu2 %vm780_vm8, %v1214_v43  ;;  %v993_v57 = vpop.permute.xlu2 %992 }
 0x1b6   : > { %v752_v1 = vsel %vm375_vm2, %v1291_v56, %v1281_v0  ;;  %v753_v2 = vsel %vm375_vm2, %v1292_v28, %v1282_v63  ;;  %1176 = vmatpush.bf16.msk.msra.mxu0 %vm1174_vm12, %v1175_v62  ;;  %897 = vmatpush.bf16.msra.mxu3 %v767_v61 }
 0x1b7   : > { %v1203_v3 = vpack.c.bf16 %v753_v2, %v752_v1 }
 0x1b8   : > { %v1285_v4 = vpop.permute.xlu1 %1284 }
 0x1b9   : > { %v1287_v5 = vunpack.i.h.bf16 %v1285_v4  ;;  %v1286_v6 = vunpack.i.l.bf16 %v1285_v4  ;;  %1177 = vmatmul.msk.bf16.vlgmr.msra.gmra.mxu0 %vm780_vm8, %v1214_v43  ;;  %1185 = vmatmul.msk.bf16.vlgmr.msra.gmra.mxu3 %vm780_vm8, %v1214_v43  ;;  %v793_v17 = vpop.f32.mrf.mxu0 }
 0x1ba   : > { %1204 = vmatpush.bf16.msk.msrb.mxu3 %vm1202_vm14, %v1203_v3  ;;  %v809_v23 = vpop.f32.mrf.mxu1 }
 0x1bb   : > { %v746_v53 = vsel %vm375_vm2, %v1286_v6, %v1291_v56  ;;  %v747_v7 = vsel %vm375_vm2, %v1287_v5, %v1292_v28  ;;  %v1295_v8 = vpop.permute.xlu0 %1294 }
 0x1bc   : > { %v909_v9 = vpack.c.bf16 %v747_v7, %v746_v53  ;;  %v1297_v10 = vunpack.i.h.bf16 %v1295_v8  ;;  %v1296_v11 = vunpack.i.l.bf16 %v1295_v8 }
 0x1be   : > { %v749_v12 = vsel %vm375_vm2, %v1297_v10, %v1287_v5  ;;  %v748_v13 = vsel %vm375_vm2, %v1296_v11, %v1286_v6  ;;  %v750_v22 = vsel %vm375_vm2, %v1281_v0, %v1296_v11  ;;  %v751_v14 = vsel %vm375_vm2, %v1282_v63, %v1297_v10  ;;  %954 = vmatpush.bf16.msrb.mxu2 %v909_v9 }
 0x1bf   : > { %v907_v15 = vpack.c.bf16 %v751_v14, %v750_v22  ;;  %v1196_v16 = vpack.c.bf16 %v749_v12, %v748_v13 }
 0x1c0   : > { %v821_v21 = vpop.f32.mrf.mxu2  ;;  %v988_v38 = vpop.permute.xlu1 %987 }
 0x1c1   : > { %926 = vmatpush.bf16.msrb.mxu0 %v907_v15  ;;  %1197 = vmatpush.bf16.msk.msrb.mxu1 %vm1195_vm0, %v1196_v16  ;;  %v795_v18 = vpop.f32.mrf.mxu0 }
 0x1c3   : > { %v1008_v46 = vpop.permute.xlu0 %1007 }
 0x1c4   : > { %1198 = vmatmul.msk.bf16.vlgmr.msrb.gmra.mxu1 %vm780_vm8, %v1216_v19  ;;  %1199 = vmatmul.msk.bf16.vlgmr.msrb.gmra.mxu2 %vm780_vm8, %v1216_v19  ;;  %v835_v24 = vpop.f32.mrf.mxu3 }
 0x1c8   : > { %v823_v25 = vpop.f32.mrf.mxu2  ;;  %v1013_v6 = vpop.permute.xlu1 %1012 }
 0x1c9   : > { %1192 = vmatmul.msk.bf16.vlgmr.msrb.gmra.mxu0 %vm780_vm8, %v1216_v19  ;;  %1205 = vmatmul.msk.bf16.vlgmr.msrb.gmra.mxu3 %vm780_vm8, %v1216_v19 }
 0x1cc   : > { %v837_v27 = vpop.f32.mrf.mxu3 }
 0x21a   : > { %v871_v26 = vpop.f32.mrf.mxu1 }
 0x21b   : > { %v872_v35 = vadd.f32 %v871_v26, %v807_v20 }
 0x222   : > { %v873_v31 = vpop.f32.mrf.mxu1 }
 0x223   : > { %v874_v47 = vadd.f32 %v873_v31, %v809_v23 }
 0x236   : > { %v857_v29 = vpop.f32.mrf.mxu0 }
 0x237   : > { %v885_v30 = vpop.f32.mrf.mxu2  ;;  %v858_v40 = vadd.f32 %v857_v29, %v793_v17 }
 0x238   : > { %v886_v42 = vadd.f32 %v885_v30, %v821_v21 }
 0x23c   : > { %v899_v32 = vpop.f32.mrf.mxu3 }
 0x23d   : > { %v900_v55 = vadd.f32 %v899_v32, %v835_v24 }
 0x23e   : > { %v859_v33 = vpop.f32.mrf.mxu0 }
 0x23f   : > { %v887_v34 = vpop.f32.mrf.mxu2  ;;  %v860_v58 = vadd.f32 %v859_v33, %v795_v18 }
 0x240   : > { %v888_v63 = vadd.f32 %v887_v34, %v823_v25 }
 0x241   : > { %v942_v36 = vpop.f32.mrf.mxu1 }
 0x242   : > { %v976_v37 = vadd.f32 %v942_v36, %v872_v35 }
 0x244   : > { %v901_v39 = vpop.f32.mrf.mxu3  ;;  %v996_v41 = vmul.f32 %v988_v38, %v976_v37 }
 0x245   : > { %v902_v10 = vadd.f32 %v901_v39, %v837_v27 }
 0x246   : > { %v928_v43 = vpop.f32.mrf.mxu0  ;;  %v1016_v50 = vadd.f32 %v1008_v46, %v996_v41 }
 0x247   : > { %v975_v44 = vadd.f32 %v928_v43, %v858_v40  ;;  %v956_v45 = vpop.f32.mrf.mxu2 }
 0x248   : > { %v977_v48 = vadd.f32 %v956_v45, %v886_v42  ;;  %v1024_v49 = vmax.f32 %v1016_v50, 0.0 }
 0x249   : > { %v995_v51 = vmul.f32 %v988_v38, %v975_v44  ;;  %v944_v52 = vpop.f32.mrf.mxu1 }
 0x24a   : > { %v980_v54 = vadd.f32 %v944_v52, %v874_v47  ;;  %v997_v56 = vmul.f32 %v988_v38, %v977_v48 }
 0x24b   : > { %v1015_v28 = vadd.f32 %v1008_v46, %v995_v51 }
 0x24c   : > { %v970_v59 = vpop.f32.mrf.mxu3  ;;  %v1000_v61 = vmul.f32 %v993_v57, %v980_v54  ;;  %v1017_v2 = vadd.f32 %v1008_v46, %v997_v56 }
 0x24d   : > { %v1023_v60 = vmax.f32 %v1015_v28, 0.0  ;;  %v978_v62 = vadd.f32 %v970_v59, %v900_v55 }
 0x24e   : > { %v930_v0 = vpop.f32.mrf.mxu0  ;;  %v1020_v7 = vadd.f32 %v1013_v6, %v1000_v61  ;;  %v1025_v11 = vmax.f32 %v1017_v2, 0.0 }
 0x24f   : > { %v1031_v1 = vpack.c.bf16 %v1024_v49, %v1023_v60  ;;  %v998_v3 = vmul.f32 %v988_v38, %v978_v62  ;;  %v979_v4 = vadd.f32 %v930_v0, %v860_v58  ;;  %v958_v5 = vpop.f32.mrf.mxu2 }
 0x250   : > { %v981_v53 = vadd.f32 %v958_v5, %v888_v63  ;;  %v1028_v15 = vmax.f32 %v1020_v7, 0.0 }
 0x251   : > { %1035 = vst [vmem:[%s1579_s24] sm:$0xff] %v1031_v1  ;;  %v1018_v8 = vadd.f32 %v1008_v46, %v998_v3  ;;  %v999_v9 = vmul.f32 %v993_v57, %v979_v4 }
 0x252   : > { %v1001_v22 = vmul.f32 %v993_v57, %v981_v53 }
 0x253   : > { %v1026_v12 = vmax.f32 %v1018_v8, 0.0  ;;  %v1019_v13 = vadd.f32 %v1013_v6, %v999_v9 }
 0x254   : > { %v972_v14 = vpop.f32.mrf.mxu3  ;;  %v1021_v21 = vadd.f32 %v1013_v6, %v1001_v22 }
 0x255   : > { %v1032_v16 = vpack.c.bf16 %v1026_v12, %v1025_v11  ;;  %v1027_v19 = vmax.f32 %v1019_v13, 0.0  ;;  %v982_v20 = vadd.f32 %v972_v14, %v902_v10 }
 0x256   : > { %v1029_v18 = vmax.f32 %v1021_v21, 0.0 }
 0x257   : > { %1036 = vst [vmem:[%s1579_s24 + $0x8] sm:$0xff] %v1032_v16  ;;  %v1033_v17 = vpack.c.bf16 %v1028_v15, %v1027_v19  ;;  %v1002_v23 = vmul.f32 %v993_v57, %v982_v20 }
 0x258   : > { %v1061_v27 = vld [vmem:[%s1579_s24] sm:$0xff] (%p1390_p4) }
 0x259   : > { %1037 = vst [vmem:[%s1579_s24 + $0x10] sm:$0xff] %v1033_v17  ;;  %v1022_v24 = vadd.f32 %v1013_v6, %v1002_v23 }
 0x25a   : > { %1062 = vst [vmem:[%s1048_s18] sm:$0xff] (%p1390_p4), %v1061_v27 }
 0x25b   : > { %v1030_v25 = vmax.f32 %v1022_v24, 0.0  ;;  %1045 = sbr.rel (!%p1390_p4) target bundleno = 616 (0x268), region = 52 }
 0x25d   : > { %v1034_v26 = vpack.c.bf16 %v1030_v25, %v1029_v18 }
 0x25e   : > { %v1063_v29 = vld [vmem:[%s1579_s24 + $0x8] sm:$0xff] (%p1390_p4) }
 0x25f   : > { %1038 = vst [vmem:[%s1579_s24 + $0x18] sm:$0xff] %v1034_v26 }
 0x260   : > { %v1065_v30 = vld [vmem:[%s1579_s24 + $0x10] sm:$0xff]  ;;  %1064 = vst [vmem:[%s1048_s18 + $0x8] sm:$0xff] %v1063_v29 }
 0x261   : > { %1066 = vst [vmem:[%s1048_s18 + $0x20] sm:$0xff] %v1065_v30 }
 0x266   : > { %v1067_v31 = vld [vmem:[%s1579_s24 + $0x18] sm:$0xff] }
 0x267   : > { %1068 = vst [vmem:[%s1048_s18 + $0x28] sm:$0xff] %v1067_v31 }
 0x268 PF: > { %p14_p8 = scmp.ge.s32.totalorder %s1380_s28, 4   ;;  %s1622_s24 = smov %s1316_s25 }
 0x269   : > { %s1623_s25 = smov %s1388_s8  ;;  %s1624_s26 = smov %s1380_s28 }
 0x26a   :  { %16 = sbr.rel (!%p14_p8) target bundleno = 2 (0x2), region = 105 }

</bundles_post_ra>
